<compile_context>
chip_gen: v7x
topology: tpu7x:2x2x1
jax: 0.10.0
libtpu: 0.0.40
codegen_flags: <defaults>
</compile_context>

<pallas_src>
import functools

import jax
import jax.numpy as jnp
from jax.experimental import pallas as pl
from jax.experimental.pallas import tpu as pltpu


def _round_up(x, m):
    return ((x + m - 1) // m) * m


def _early_fusion_kernel(a_ref, v_ref, p_ref,
                         w1a_ref, w1v_ref, w1p_ref, b1_ref,
                         w2_ref, b2_ref,
                         out_ref,
                         a_acc, v_acc):
    s = pl.program_id(1)

    @pl.when(s == 0)
    def _init():
        a_acc[...] = jnp.zeros_like(a_acc)
        v_acc[...] = jnp.zeros_like(v_acc)

    # Accumulate sequence sums in f32 (the mean's 1/S is folded into W1 in
    # the wrapper, so no per-element divide is needed here).  Zero padding
    # along B/S does not affect the sums.
    a_acc[...] += jnp.sum(a_ref[...].astype(jnp.float32), axis=1)
    v_acc[...] += jnp.sum(v_ref[...].astype(jnp.float32), axis=1)

    @pl.when(s == pl.num_programs(1) - 1)
    def _finish():
        cdt = w1a_ref.dtype                       # compute dtype (bf16 or f32)
        a_agg = a_acc[...].astype(cdt)
        v_agg = v_acc[...].astype(cdt)
        p = p_ref[...].astype(cdt)

        # fc1 on the (virtually) concatenated features: sum of three matmuls
        # against wrapper-split W1 blocks (K-aligned, no in-kernel slicing).
        h = (jnp.dot(a_agg, w1a_ref[...], preferred_element_type=jnp.float32)
             + jnp.dot(v_agg, w1v_ref[...], preferred_element_type=jnp.float32)
             + jnp.dot(p, w1p_ref[...], preferred_element_type=jnp.float32)
             + b1_ref[...])                       # [B_tile, H_pad] f32
        h = jnp.maximum(h, 0.0)                   # ReLU
        # Dropout: identity at inference time.

        logits = jnp.dot(h.astype(w2_ref.dtype), w2_ref[...],
                         preferred_element_type=jnp.float32) + b2_ref[...]
        out_ref[...] = logits.astype(out_ref.dtype)


def early_fusion_mlp(A_feat, V_feat, P_feat, w1, b1, w2, b2,
                     *, audio_dim, video_dim, pers_dim,
                     compute_dtype=jnp.bfloat16,
                     vmem_budget_bytes=24 * 1024 * 1024):
    """Forward pass of EarlyFusionMLP. Weights stored as [in_dim, out_dim]."""
    # Normalize input ranks (mirror aggregate_features / forward semantics:
    # 2-D A/V are treated as already aggregated == mean over a length-1 seq).
    if A_feat.ndim == 2:
        A_feat = A_feat[:, None, :]
    if V_feat.ndim == 2:
        V_feat = V_feat[:, None, :]
    if P_feat.ndim == 1:
        P_feat = P_feat[None, :]

    B, S_a, Da = A_feat.shape
    _, S_v, Dv = V_feat.shape
    Dp = P_feat.shape[1]
    assert Da == audio_dim and Dv == video_dim and Dp == pers_dim

    H = w1.shape[1]
    C = w2.shape[1]
    H_pad = _round_up(H, 128)        # lane-dense hidden width

    # ---- weight prep (wrapper side): split W1, fold 1/S, pad H, cast ----
    w1f = w1.astype(jnp.float32)
    w1_a = w1f[:audio_dim] * (1.0 / S_a)
    w1_v = w1f[audio_dim:audio_dim + video_dim] * (1.0 / S_v)
    w1_p = w1f[audio_dim + video_dim:audio_dim + video_dim + pers_dim]

    def _pad_cols(m):
        return jnp.pad(m, ((0, 0), (0, H_pad - H))).astype(compute_dtype)

    w1_a, w1_v, w1_p = _pad_cols(w1_a), _pad_cols(w1_v), _pad_cols(w1_p)
    b1_p = jnp.pad(b1.astype(jnp.float32), (0, H_pad - H)).reshape(1, H_pad)
    w2_p = jnp.pad(w2.astype(jnp.float32),
                   ((0, H_pad - H), (0, 0))).astype(compute_dtype)
    b2_p = b2.astype(jnp.float32).reshape(1, C)

    # ---- tiling: batch tiles (parallel) x seq chunks (reduction, last) ----
    S_pad = _round_up(max(S_a, S_v, 1), 8)
    S_chunk = min(S_pad, 128)
    S_pad = _round_up(S_pad, S_chunk)

    # Double-buffered A+V input blocks must fit the VMEM budget.
    a_isz = jnp.dtype(A_feat.dtype).itemsize
    v_isz = jnp.dtype(V_feat.dtype).itemsize
    bytes_per_brow = 2 * S_chunk * (Da * a_isz + Dv * v_isz)   # 2x = dbl-buffer
    B8 = _round_up(B, 8)
    bt = (vmem_budget_bytes // max(bytes_per_brow, 1)) // 8 * 8
    B_tile = int(max(8, min(B8, bt, 1024)))
    B_pad = _round_up(B8, B_tile)

    def _pad_bsd(x, s_target):
        b_, s_, _ = x.shape
        return jnp.pad(x, ((0, B_pad - b_), (0, s_target - s_), (0, 0)))

    A_p = _pad_bsd(A_feat, S_pad)                 # zero pad: sums unaffected
    V_p = _pad_bsd(V_feat, S_pad)
    P_p = jnp.pad(P_feat, ((0, B_pad - B), (0, 0)))

    grid = (B_pad // B_tile, S_pad // S_chunk)

    grid_spec = pltpu.PrefetchScalarGridSpec(
        num_scalar_prefetch=0,
        grid=grid,
        in_specs=[
            pl.BlockSpec((B_tile, S_chunk, Da), lambda i, s: (i, s, 0)),
            pl.BlockSpec((B_tile, S_chunk, Dv), lambda i, s: (i, s, 0)),
            pl.BlockSpec((B_tile, Dp), lambda i, s: (i, 0)),
            pl.BlockSpec((Da, H_pad), lambda i, s: (0, 0)),   # weights stay
            pl.BlockSpec((Dv, H_pad), lambda i, s: (0, 0)),   # VMEM-resident
            pl.BlockSpec((Dp, H_pad), lambda i, s: (0, 0)),
            pl.BlockSpec((1, H_pad), lambda i, s: (0, 0)),
            pl.BlockSpec((H_pad, C), lambda i, s: (0, 0)),
            pl.BlockSpec((1, C), lambda i, s: (0, 0)),
        ],
        out_specs=pl.BlockSpec((B_tile, C), lambda i, s: (i, 0)),
        scratch_shapes=[
            pltpu.VMEM((B_tile, Da), jnp.float32),   # pooled-sum accumulators
            pltpu.VMEM((B_tile, Dv), jnp.float32),
        ],
    )

    out = pl.pallas_call(
        _early_fusion_kernel,
        out_shape=jax.ShapeDtypeStruct((B_pad, C), jnp.float32),
        grid_spec=grid_spec,
        compiler_params=pltpu.CompilerParams(
            dimension_semantics=("parallel", "arbitrary"),
            vmem_limit_bytes=48 * 1024 * 1024,
        ),
    )(A_p, V_p, P_p, w1_a, w1_v, w1_p, b1_p, w2_p, b2_p)

    return out[:B]


def early_fusion_mlp_ref(A_feat, V_feat, P_feat, w1, b1, w2, b2):
    a_agg = jnp.mean(A_feat, axis=1) if A_feat.ndim == 3 else A_feat
    v_agg = jnp.mean(V_feat, axis=1) if V_feat.ndim == 3 else V_feat
    x = jnp.concatenate([a_agg, v_agg, P_feat], axis=1)
    h = jnp.maximum(x @ w1 + b1, 0.0)
    return h @ w2 + b2


if __name__ == "__main__":
    # Small shapes consistent with the module's forward.
    batch, seq_len = 2, 8
    audio_dim, video_dim, pers_dim = 16, 24, 32
    hidden_dim, num_classes = 32, 3
    concat_dim = audio_dim + video_dim + pers_dim

    key = jax.random.PRNGKey(0)
    ka, kv, kp, kw1, kb1, kw2, kb2 = jax.random.split(key, 7)

    A_feat = jax.random.normal(ka, (batch, seq_len, audio_dim), jnp.float32)
    V_feat = jax.random.normal(kv, (batch, seq_len, video_dim), jnp.float32)
    P_feat = jax.random.normal(kp, (batch, pers_dim), jnp.float32)

    # Deterministic parameter init (Linear weights stored as [in, out]).
    w1 = jax.random.normal(kw1, (concat_dim, hidden_dim), jnp.float32) * 0.05
    b1 = jax.random.normal(kb1, (hidden_dim,), jnp.float32) * 0.05
    w2 = jax.random.normal(kw2, (hidden_dim, num_classes), jnp.float32) * 0.05
    b2 = jax.random.normal(kb2, (num_classes,), jnp.float32) * 0.05

    run = functools.partial(early_fusion_mlp,
                            audio_dim=audio_dim, video_dim=video_dim,
                            pers_dim=pers_dim)
    ref = early_fusion_mlp_ref(A_feat, V_feat, P_feat, w1, b1, w2, b2)

    # f32 path: exact-semantics check.
    logits_f32 = jax.block_until_ready(
        run(A_feat, V_feat, P_feat, w1, b1, w2, b2,
            compute_dtype=jnp.float32))
    assert logits_f32.shape == (batch, num_classes)
    assert jnp.allclose(logits_f32, ref, atol=1e-4, rtol=1e-4), \
        f"f32 mismatch:\n{logits_f32}\nvs\n{ref}"

    # bf16 MXU path (default, performance mode): looser tolerance.
    logits_bf16 = jax.block_until_ready(
        run(A_feat, V_feat, P_feat, w1, b1, w2, b2))
    assert logits_bf16.shape == (batch, num_classes)
    assert jnp.allclose(logits_bf16, ref, atol=5e-2, rtol=5e-2), \
        f"bf16 mismatch:\n{logits_bf16}\nvs\n{ref}"

    # NOTE: at these toy shapes the kernel is pure fixed overhead; tune
    # B_tile / S_chunk / vmem_budget_bytes at production batch & seq sizes.
    print("KERNEL_OK")
</pallas_src>

<mosaic_0001>
module attributes {stable_mosaic.version = 11 : i64} {
  func.func @_early_fusion_kernel(%arg0: i32, %arg1: i32, %arg2: memref<8x8x16xf32, #tpu.memory_space<vmem>>, %arg3: memref<8x8x24xf32, #tpu.memory_space<vmem>>, %arg4: memref<8x32xf32, #tpu.memory_space<vmem>>, %arg5: memref<16x128xf32, #tpu.memory_space<vmem>>, %arg6: memref<24x128xf32, #tpu.memory_space<vmem>>, %arg7: memref<32x128xf32, #tpu.memory_space<vmem>>, %arg8: memref<1x128xf32, #tpu.memory_space<vmem>>, %arg9: memref<128x3xf32, #tpu.memory_space<vmem>>, %arg10: memref<1x3xf32, #tpu.memory_space<vmem>>, %arg11: memref<8x3xf32, #tpu.memory_space<vmem>>, %arg12: memref<8x16xf32, #tpu.memory_space<vmem>>, %arg13: memref<8x24xf32, #tpu.memory_space<vmem>>) attributes {dimension_semantics = [#tpu.dimension_semantics<parallel>, #tpu.dimension_semantics<arbitrary>], iteration_bounds = array<i64: 1, 1>, scalar_prefetch = 0 : i64, scratch_operands = 2 : i64, tpu.core_type = #tpu.core_type<tc>, window_params = [{transform_indices = @transform_0, window_bounds = array<i64: 8, 8, 16>}, {transform_indices = @transform_1, window_bounds = array<i64: 8, 8, 24>}, {transform_indices = @transform_2, window_bounds = array<i64: 8, 32>}, {pipeline_mode = #tpu.pipeline_mode<synchronous>, transform_indices = @transform_3, window_bounds = array<i64: 16, 128>}, {pipeline_mode = #tpu.pipeline_mode<synchronous>, transform_indices = @transform_4, window_bounds = array<i64: 24, 128>}, {pipeline_mode = #tpu.pipeline_mode<synchronous>, transform_indices = @transform_5, window_bounds = array<i64: 32, 128>}, {pipeline_mode = #tpu.pipeline_mode<synchronous>, transform_indices = @transform_6, window_bounds = array<i64: 1, 128>}, {pipeline_mode = #tpu.pipeline_mode<synchronous>, transform_indices = @transform_7, window_bounds = array<i64: 128, 3>}, {pipeline_mode = #tpu.pipeline_mode<synchronous>, transform_indices = @transform_8, window_bounds = array<i64: 1, 3>}, {transform_indices = @transform_9, window_bounds = array<i64: 8, 3>}]} {
    %c0_i32 = arith.constant 0 : i32
    %0 = arith.cmpi eq, %arg1, %c0_i32 : i32
    %1 = arith.extui %0 : i1 to i32
    %c0_i32_0 = arith.constant 0 : i32
    %2 = arith.cmpi ne, %1, %c0_i32_0 : i32
    scf.if %2 {
      %cst_17 = arith.constant 0.000000e+00 : f32
      %16 = vector.broadcast %cst_17 : f32 to vector<8x16xf32>
      %c0_18 = arith.constant 0 : index
      %c0_19 = arith.constant 0 : index
      %17 = vector.load %arg12[%c0_18, %c0_19] : memref<8x16xf32, #tpu.memory_space<vmem>>, vector<8x16xf32>
      tpu.vector_store %arg12[%c0_18, %c0_19], %16 {strides = array<i32>} : memref<8x16xf32, #tpu.memory_space<vmem>>, vector<8x16xf32>,
      %cst_20 = arith.constant 0.000000e+00 : f32
      %18 = vector.broadcast %cst_20 : f32 to vector<8x24xf32>
      %c0_21 = arith.constant 0 : index
      %c0_22 = arith.constant 0 : index
      %19 = vector.load %arg13[%c0_21, %c0_22] : memref<8x24xf32, #tpu.memory_space<vmem>>, vector<8x24xf32>
      tpu.vector_store %arg13[%c0_21, %c0_22], %18 {strides = array<i32>} : memref<8x24xf32, #tpu.memory_space<vmem>>, vector<8x24xf32>,
    } else {
    }
    %c0 = arith.constant 0 : index
    %c0_1 = arith.constant 0 : index
    %3 = vector.load %arg12[%c0, %c0_1] : memref<8x16xf32, #tpu.memory_space<vmem>>, vector<8x16xf32>
    %c0_2 = arith.constant 0 : index
    %c0_3 = arith.constant 0 : index
    %c0_4 = arith.constant 0 : index
    %4 = vector.load %arg2[%c0_2, %c0_3, %c0_4] : memref<8x8x16xf32, #tpu.memory_space<vmem>>, vector<8x8x16xf32>
    %cst = arith.constant dense<0.000000e+00> : vector<8x16xf32>
    %5 = vector.multi_reduction <add>, %4, %cst [1] : vector<8x8x16xf32> to vector<8x16xf32>
    %6 = arith.addf %3, %5 : vector<8x16xf32>
    %c0_5 = arith.constant 0 : index
    %c0_6 = arith.constant 0 : index
    %7 = vector.load %arg12[%c0_5, %c0_6] : memref<8x16xf32, #tpu.memory_space<vmem>>, vector<8x16xf32>
    tpu.vector_store %arg12[%c0_5, %c0_6], %6 {strides = array<i32>} : memref<8x16xf32, #tpu.memory_space<vmem>>, vector<8x16xf32>,
    %c0_7 = arith.constant 0 : index
    %c0_8 = arith.constant 0 : index
    %8 = vector.load %arg13[%c0_7, %c0_8] : memref<8x24xf32, #tpu.memory_space<vmem>>, vector<8x24xf32>
    %c0_9 = arith.constant 0 : index
    %c0_10 = arith.constant 0 : index
    %c0_11 = arith.constant 0 : index
    %9 = vector.load %arg3[%c0_9, %c0_10, %c0_11] : memref<8x8x24xf32, #tpu.memory_space<vmem>>, vector<8x8x24xf32>
    %cst_12 = arith.constant dense<0.000000e+00> : vector<8x24xf32>
    %10 = vector.multi_reduction <add>, %9, %cst_12 [1] : vector<8x8x24xf32> to vector<8x24xf32>
    %11 = arith.addf %8, %10 : vector<8x24xf32>
    %c0_13 = arith.constant 0 : index
    %c0_14 = arith.constant 0 : index
    %12 = vector.load %arg13[%c0_13, %c0_14] : memref<8x24xf32, #tpu.memory_space<vmem>>, vector<8x24xf32>
    tpu.vector_store %arg13[%c0_13, %c0_14], %11 {strides = array<i32>} : memref<8x24xf32, #tpu.memory_space<vmem>>, vector<8x24xf32>,
    %c0_i32_15 = arith.constant 0 : i32
    %13 = arith.cmpi eq, %arg1, %c0_i32_15 : i32
    %14 = arith.extui %13 : i1 to i32
    %c0_i32_16 = arith.constant 0 : i32
    %15 = arith.cmpi ne, %14, %c0_i32_16 : i32
    scf.if %15 {
      %c0_17 = arith.constant 0 : index
      %c0_18 = arith.constant 0 : index
      %16 = vector.load %arg12[%c0_17, %c0_18] : memref<8x16xf32, #tpu.memory_space<vmem>>, vector<8x16xf32>
      %c0_19 = arith.constant 0 : index
      %c0_20 = arith.constant 0 : index
      %17 = vector.load %arg13[%c0_19, %c0_20] : memref<8x24xf32, #tpu.memory_space<vmem>>, vector<8x24xf32>
      %c0_21 = arith.constant 0 : index
      %c0_22 = arith.constant 0 : index
      %18 = vector.load %arg4[%c0_21, %c0_22] : memref<8x32xf32, #tpu.memory_space<vmem>>, vector<8x32xf32>
      %c0_23 = arith.constant 0 : index
      %c0_24 = arith.constant 0 : index
      %19 = vector.load %arg5[%c0_23, %c0_24] : memref<16x128xf32, #tpu.memory_space<vmem>>, vector<16x128xf32>
      %cst_25 = arith.constant dense<0.000000e+00> : vector<8x128xf32>
      %20 = tpu.matmul %16, %19, %cst_25 {dimension_numbers = #tpu.dot_dimension_numbers<[1], [0], [0], [1], [0, 0, 1, 1], [], []>} : vector<8x16xf32>, vector<16x128xf32>, vector<8x128xf32> -> vector<8x128xf32>
      %c0_26 = arith.constant 0 : index
      %c0_27 = arith.constant 0 : index
      %21 = vector.load %arg6[%c0_26, %c0_27] : memref<24x128xf32, #tpu.memory_space<vmem>>, vector<24x128xf32>
      %cst_28 = arith.constant dense<0.000000e+00> : vector<8x128xf32>
      %22 = tpu.matmul %17, %21, %cst_28 {dimension_numbers = #tpu.dot_dimension_numbers<[1], [0], [0], [1], [0, 0, 1, 1], [], []>} : vector<8x24xf32>, vector<24x128xf32>, vector<8x128xf32> -> vector<8x128xf32>
      %23 = arith.addf %20, %22 : vector<8x128xf32>
      %c0_29 = arith.constant 0 : index
      %c0_30 = arith.constant 0 : index
      %24 = vector.load %arg7[%c0_29, %c0_30] : memref<32x128xf32, #tpu.memory_space<vmem>>, vector<32x128xf32>
      %cst_31 = arith.constant dense<0.000000e+00> : vector<8x128xf32>
      %25 = tpu.matmul %18, %24, %cst_31 {dimension_numbers = #tpu.dot_dimension_numbers<[1], [0], [0], [1], [0, 0, 1, 1], [], []>} : vector<8x32xf32>, vector<32x128xf32>, vector<8x128xf32> -> vector<8x128xf32>
      %26 = arith.addf %23, %25 : vector<8x128xf32>
      %c0_32 = arith.constant 0 : index
      %c0_33 = arith.constant 0 : index
      %27 = vector.load %arg8[%c0_32, %c0_33] : memref<1x128xf32, #tpu.memory_space<vmem>>, vector<1x128xf32>
      %28 = vector.broadcast %27 : vector<1x128xf32> to vector<8x128xf32>
      %29 = arith.addf %26, %28 : vector<8x128xf32>
      %cst_34 = arith.constant 0.000000e+00 : f32
      %30 = vector.broadcast %cst_34 : f32 to vector<8x128xf32>
      %31 = arith.maximumf %29, %30 : vector<8x128xf32>
      %c0_35 = arith.constant 0 : index
      %c0_36 = arith.constant 0 : index
      %32 = vector.load %arg9[%c0_35, %c0_36] : memref<128x3xf32, #tpu.memory_space<vmem>>, vector<128x3xf32>
      %cst_37 = arith.constant dense<0.000000e+00> : vector<8x3xf32>
      %33 = tpu.matmul %31, %32, %cst_37 {dimension_numbers = #tpu.dot_dimension_numbers<[1], [0], [0], [1], [0, 0, 1, 1], [], []>} : vector<8x128xf32>, vector<128x3xf32>, vector<8x3xf32> -> vector<8x3xf32>
      %c0_38 = arith.constant 0 : index
      %c0_39 = arith.constant 0 : index
      %34 = vector.load %arg10[%c0_38, %c0_39] : memref<1x3xf32, #tpu.memory_space<vmem>>, vector<1x3xf32>
      %35 = vector.broadcast %34 : vector<1x3xf32> to vector<8x3xf32>
      %36 = arith.addf %33, %35 : vector<8x3xf32>
      %c0_40 = arith.constant 0 : index
      %c0_41 = arith.constant 0 : index
      %37 = vector.load %arg11[%c0_40, %c0_41] : memref<8x3xf32, #tpu.memory_space<vmem>>, vector<8x3xf32>
      tpu.vector_store %arg11[%c0_40, %c0_41], %36 {strides = array<i32>} : memref<8x3xf32, #tpu.memory_space<vmem>>, vector<8x3xf32>,
    } else {
    }
    return
  }
  func.func @transform_0(%arg0: i32, %arg1: i32) -> (i32, i32, i32) {
    %c0_i32 = arith.constant 0 : i32
    %c0_i32_0 = arith.constant 0 : i32
    return %arg0, %arg1, %c0_i32 : i32, i32, i32
  }
  func.func @transform_1(%arg0: i32, %arg1: i32) -> (i32, i32, i32) {
    %c0_i32 = arith.constant 0 : i32
    %c0_i32_0 = arith.constant 0 : i32
    return %arg0, %arg1, %c0_i32 : i32, i32, i32
  }
  func.func @transform_2(%arg0: i32, %arg1: i32) -> (i32, i32) {
    %c0_i32 = arith.constant 0 : i32
    %c0_i32_0 = arith.constant 0 : i32
    return %arg0, %c0_i32 : i32, i32
  }
  func.func @transform_3(%arg0: i32, %arg1: i32) -> (i32, i32) {
    %c0_i32 = arith.constant 0 : i32
    %c0_i32_0 = arith.constant 0 : i32
    %c0_i32_1 = arith.constant 0 : i32
    return %c0_i32, %c0_i32_0 : i32, i32
  }
  func.func @transform_4(%arg0: i32, %arg1: i32) -> (i32, i32) {
    %c0_i32 = arith.constant 0 : i32
    %c0_i32_0 = arith.constant 0 : i32
    %c0_i32_1 = arith.constant 0 : i32
    return %c0_i32, %c0_i32_0 : i32, i32
  }
  func.func @transform_5(%arg0: i32, %arg1: i32) -> (i32, i32) {
    %c0_i32 = arith.constant 0 : i32
    %c0_i32_0 = arith.constant 0 : i32
    %c0_i32_1 = arith.constant 0 : i32
    return %c0_i32, %c0_i32_0 : i32, i32
  }
  func.func @transform_6(%arg0: i32, %arg1: i32) -> (i32, i32) {
    %c0_i32 = arith.constant 0 : i32
    %c0_i32_0 = arith.constant 0 : i32
    %c0_i32_1 = arith.constant 0 : i32
    return %c0_i32, %c0_i32_0 : i32, i32
  }
  func.func @transform_7(%arg0: i32, %arg1: i32) -> (i32, i32) {
    %c0_i32 = arith.constant 0 : i32
    %c0_i32_0 = arith.constant 0 : i32
    %c0_i32_1 = arith.constant 0 : i32
    return %c0_i32, %c0_i32_0 : i32, i32
  }
  func.func @transform_8(%arg0: i32, %arg1: i32) -> (i32, i32) {
    %c0_i32 = arith.constant 0 : i32
    %c0_i32_0 = arith.constant 0 : i32
    %c0_i32_1 = arith.constant 0 : i32
    return %c0_i32, %c0_i32_0 : i32, i32
  }
  func.func @transform_9(%arg0: i32, %arg1: i32) -> (i32, i32) {
    %c0_i32 = arith.constant 0 : i32
    %c0_i32_0 = arith.constant 0 : i32
    return %arg0, %c0_i32 : i32, i32
  }
}

</mosaic_0001>

<bundles_post_ra>
// kernel: tpu_custom_call.1
= control target key start
LH: loop header
LB: loop body
LE: loop exit
PB: predicated region body
PF: predicated region fallthrough
CT: control target
= control target key end

     0   :  { %14 = vsyncpa [#allocation5], 0  ;;  %s1089_s0 = inlined_call_operand.vmem [shape: f32[8,8,16], index: 0, kind: input, shape index: {}]   ;;  %s1090_s1 = inlined_call_operand.vmem [shape: f32[8,8,24], index: 1, kind: input, shape index: {}]   ;;  %s1091_s2 = inlined_call_operand.vmem [shape: f32[8,32], index: 2, kind: input, shape index: {}]   ;;  %s1092_s3 = inlined_call_operand.hbm [shape: f32[16,128], index: 3, kind: input, shape index: {}]   ;;  %s1093_s4 = inlined_call_operand.hbm [shape: f32[24,128], index: 4, kind: input, shape index: {}]   ;;  %s1094_s5 = inlined_call_operand.hbm [shape: f32[32,128], index: 5, kind: input, shape index: {}]   ;;  %s1095_s6 = inlined_call_operand.vmem [shape: f32[1,128], index: 6, kind: input, shape index: {}]   ;;  %s1096_s7 = inlined_call_operand.vmem [shape: f32[128,3], index: 7, kind: input, shape index: {}]   ;;  %s1097_s8 = inlined_call_operand.vmem [shape: f32[1,3], index: 8, kind: input, shape index: {}]   ;;  %s1098_s9 = inlined_call_operand.vmem [shape: f32[8,3], index: 9, kind: output, shape index: {}]  }
   0x1   :  { %15 = vsyncpa [#allocation7], 0  ;;  %s812_s30 = smov [#allocation6]   ;;  %s813_s11 = smov [#allocation4]  }
   0x2   :  { %s39_s10 = sshll.u32 %s812_s30, 4  ;;  %s27_s12 = sshll.u32 %s813_s11, 4  ;;  %s40_s10 = int_to_ptr.vmem [resolvable:$true] %s39_s10  ;;  %s870_s12 = int_to_ptr.vmem [resolvable:$true] %s27_s12 }
   0x3   :  { %s742_s15 = scalar_lea.hbm %s1093_s4, 384 }
   0x4   :  { %p743_p0 = scmp.ne.s32.totalorder %s1093_s4, %s742_s15  ;;  %p746_p1 = scmp.lt.u32.totalorder %s742_s15, %s1093_s4 }
   0x6   :  { %p748_p2 = pnand %p746_p1, %p743_p0 }
   0x8   :  { %751 = shalt.err (!%p748_p2)
}
   0x9   :  { %s752_s20 = scalar_lea.vmem %s40_s10, 384  ;;  %p757_p4 = scmp.lt.s32.totalorder %s40_s10, %s40_s10 }
   0xa   :  { %p753_p3 = scmp.ne.s32.totalorder %s40_s10, %s752_s20  ;;  %p758_p5 = scmp.lt.s32.totalorder %s752_s20, %s752_s20 }
   0xc   :  { %p759_p6 = por %p758_p5, %p757_p4 }
   0xe   :  { %p760_p7 = pnand %p759_p6, %p753_p3 }
  0x10   :  { %763 = shalt.err (!%p760_p7)
}
  0x11   :  { %s814_s21 = smov 128   ;;  %s815_s22 = smov 8  }
  0x12   :  { %45 = dma.hbm_to_vmem [thread:$0]  %s1093_s4, 384, %s40_s10, [#allocation7], %s814_s21, %s814_s21, %s815_s22  }
  0x13   :  { %s764_s27 = scalar_lea.hbm %s1092_s3, 256 }
  0x14   :  { %p765_p8 = scmp.ne.s32.totalorder %s1092_s3, %s764_s27  ;;  %p768_p9 = scmp.lt.u32.totalorder %s764_s27, %s1092_s3 }
  0x16   :  { %p770_p10 = pnand %p768_p9, %p765_p8 }
  0x18   :  { %773 = shalt.err (!%p770_p10)
}
  0x19   :  { %s774_s13 = scalar_lea.vmem %s870_s12, 256  ;;  %p779_p12 = scmp.lt.s32.totalorder %s870_s12, %s870_s12 }
  0x1a   :  { %p775_p11 = scmp.ne.s32.totalorder %s870_s12, %s774_s13  ;;  %p780_p13 = scmp.lt.s32.totalorder %s774_s13, %s774_s13 }
  0x1c   :  { %p781_p0 = por %p780_p13, %p779_p12 }
  0x1e   :  { %p782_p1 = pnand %p781_p0, %p775_p11 }
  0x20   :  { %785 = shalt.err (!%p782_p1)
}
  0x21   :  { %33 = dma.hbm_to_vmem [thread:$0]  %s1092_s3, 256, %s870_s12, [#allocation5], %s814_s21, %s814_s21, %s815_s22  }
  0x22   :  { %s816_s14 = smov [#allocation8]   ;;  %s786_s18 = scalar_lea.hbm %s1094_s5, 512 }
  0x23   :  { %s51_s15 = sshll.u32 %s816_s14, 4  ;;  %p787_p2 = scmp.ne.s32.totalorder %s1094_s5, %s786_s18  ;;  %s52_s15 = int_to_ptr.vmem [resolvable:$true] %s51_s15 }
  0x24   :  { %p790_p3 = scmp.lt.u32.totalorder %s786_s18, %s1094_s5 }
  0x26   :  { %p792_p4 = pnand %p790_p3, %p787_p2 }
  0x28   :  { %795 = shalt.err (!%p792_p4)
}
  0x29   :  { %s796_s25 = scalar_lea.vmem %s52_s15, 512  ;;  %p801_p6 = scmp.lt.s32.totalorder %s52_s15, %s52_s15 }
  0x2a   :  { %p797_p5 = scmp.ne.s32.totalorder %s52_s15, %s796_s25  ;;  %p802_p7 = scmp.lt.s32.totalorder %s796_s25, %s796_s25 }
  0x2c   :  { %p803_p8 = por %p802_p7, %p801_p6 }
  0x2e   :  { %p804_p9 = pnand %p803_p8, %p797_p5 }
  0x30   :  { %807 = shalt.err (!%p804_p9)
}
  0x31   :  { %57 = dma.hbm_to_vmem [thread:$0]  %s1094_s5, 512, %s52_s15, [#allocation7], %s814_s21, %s814_s21, %s815_s22  }
  0x32   :  { %808 = dma.done.wait [#allocation5], 256  }
  0x33   :  { %809 = vsyncadd [#allocation5], 4294967040 }
  0x34   :  { %810 = dma.done.wait [#allocation7], 896  }
  0x35   :  { %811 = vsyncadd [#allocation7], 4294966400  ;;  %vm77_vm0 = vcmask 130048   ;;  %vm79_vm1 = vcmask 195584   ;;  %v817_v0 = vmov 0.0|0.0   ;;  %v818_v1 = vmov 0.0  }
  0x36   :  { %698 = vmatprep.subr.bf16.mxu1 %v817_v0  ;;  %78 = vst.msk [vmem:[#allocation2] sm:$0xff] %vm77_vm0, %v818_v1  ;;  %710 = vmatprep.subr.bf16.mxu0 %v817_v0  ;;  %vm819_vm2 = vmmov 0   ;;  %v264_v2 = vld [vmem:[#allocation6] sm:$0xff]  ;;  %v265_v3 = vld [vmem:[#allocation6 + $0x8] sm:$0xff]  ;;  %v84_v7 = vld [vmem:[%s1089_s0 + $0x10] sm:$0xff]  ;;  %vm155_vm3 = vcmask 1041409  }
  0x37   :  { %80 = vst.msk [vmem:[#allocation3] sm:$0xff] %vm79_vm1, %v818_v1  ;;  %642 = vmatprep.mubr.msk.f32.mxu1 %vm819_vm2, %v818_v1  ;;  %695 = vmatprep.mubr.msk.f32.mxu0 %vm819_vm2, %v818_v1  ;;  %v82_v4 = vld [vmem:[%s1089_s0] sm:$0xff]  ;;  %v699_v5 = vpack.c.bf16 %v265_v3, %v264_v2  ;;  %v83_v6 = vld [vmem:[%s1089_s0 + $0x8] sm:$0xff]  ;;  %v85_v9 = vld [vmem:[%s1089_s0 + $0x18] sm:$0xff]  ;;  %v105_v14 = vsel %vm77_vm0, %v84_v7, 0.0  ;;  %vm157_vm4 = vcmask 1042434  }
  0x38   :  { %v91_v8 = vsel %vm77_vm0, %v82_v4, 0.0  ;;  %v86_v10 = vld [vmem:[%s1089_s0 + $0x20] sm:$0xff]  ;;  %v87_v11 = vld [vmem:[%s1089_s0 + $0x28] sm:$0xff]  ;;  %v98_v13 = vsel %vm77_vm0, %v83_v6, 0.0  ;;  %v88_v15 = vld [vmem:[%s1089_s0 + $0x30] sm:$0xff]  ;;  %v106_v17 = vrot.slane %v105_v14, 4 }
  0x39   :  { %v92_v12 = vrot.slane %v91_v8, 4  ;;  %700 = vmatpush3.bf16.msra.mxu1 %v699_v5  ;;  %v99_v16 = vrot.slane %v98_v13, 4  ;;  %v112_v18 = vsel %vm77_vm0, %v85_v9, 0.0  ;;  %v119_v19 = vsel %vm77_vm0, %v86_v10, 0.0  ;;  %v89_v20 = vld [vmem:[%s1089_s0 + $0x38] sm:$0xff]  ;;  %v266_v37 = vld [vmem:[#allocation6 + $0x10] sm:$0xff] }
  0x3a   :  { %v113_v22 = vrot.slane %v112_v18, 4  ;;  %v120_v23 = vrot.slane %v119_v19, 4  ;;  %v126_v24 = vsel %vm77_vm0, %v87_v11, 0.0  ;;  %640 = vmatprep.subr.mxu1 %v818_v1  ;;  %v107_v26 = vadd.f32 %v106_v17, %v105_v14  ;;  %v173_v54 = vld [vmem:[%s1090_s1] sm:$0xff]  ;;  %v174_v63 = vld [vmem:[%s1090_s1 + $0x8] sm:$0xff]  ;;  %v175_v2 = vld [vmem:[%s1090_s1 + $0x10] sm:$0xff] }
  0x3b   :  { %v93_v21 = vadd.f32 %v92_v12, %v91_v8  ;;  %v100_v25 = vadd.f32 %v99_v16, %v98_v13  ;;  %v127_v27 = vrot.slane %v126_v24, 4  ;;  %v133_v28 = vsel %vm77_vm0, %v88_v15, 0.0  ;;  %v176_v10 = vld [vmem:[%s1090_s1 + $0x18] sm:$0xff]  ;;  %v177_v11 = vld [vmem:[%s1090_s1 + $0x20] sm:$0xff] }
  0x3c   :  { %v114_v30 = vadd.f32 %v113_v22, %v112_v18  ;;  %v121_v31 = vadd.f32 %v120_v23, %v119_v19  ;;  %v134_v32 = vrot.slane %v133_v28, 4  ;;  %v108_v34 = vrot.slane %v107_v26, 2  ;;  %v178_v22 = vld [vmem:[%s1090_s1 + $0x28] sm:$0xff] }
  0x3d   :  { %v94_v29 = vrot.slane %v93_v21, 2  ;;  %v101_v33 = vrot.slane %v100_v25, 2  ;;  %v128_v35 = vadd.f32 %v127_v27, %v126_v24  ;;  %v140_v36 = vsel %vm77_vm0, %v89_v20, 0.0  ;;  %641 = vmatpush3.msra.mxu1 %v266_v37 }
  0x3e   :  { %v115_v39 = vrot.slane %v114_v30, 2  ;;  %v122_v40 = vrot.slane %v121_v31, 2  ;;  %v135_v41 = vadd.f32 %v134_v32, %v133_v28  ;;  %vm159_vm5 = vcmask 1043459   ;;  %701 = vmatprep.subr.bf16.mxu1 %v817_v0  ;;  %v179_v32 = vld [vmem:[%s1090_s1 + $0x30] sm:$0xff] }
  0x3f   :  { %v95_v38 = vadd.f32 %v94_v29, %v93_v21  ;;  %v102_v42 = vadd.f32 %v101_v33, %v100_v25  ;;  %v109_v43 = vadd.f32 %v108_v34, %v107_v26  ;;  %v129_v44 = vrot.slane %v128_v35, 2  ;;  %v81_v26 = vld [vmem:[#allocation2] sm:$0xff] }
  0x40   :  { %v141_v45 = vrot.slane %v140_v36, 4  ;;  %vm161_vm6 = vcmask 1044484   ;;  %v116_v47 = vadd.f32 %v115_v39, %v114_v30  ;;  %v123_v48 = vadd.f32 %v122_v40, %v121_v31 }
  0x41   :  { %v96_v46 = vrot.slane %v95_v38, 1  ;;  %v136_v49 = vrot.slane %v135_v41, 2  ;;  %vm163_vm7 = vcmask 1045509   ;;  %v103_v50 = vrot.slane %v102_v42, 1 }
  0x42   :  { %v110_v51 = vrot.slane %v109_v43, 1  ;;  %v130_v52 = vadd.f32 %v129_v44, %v128_v35  ;;  %v142_v53 = vadd.f32 %v141_v45, %v140_v36  ;;  %vm165_vm8 = vcmask 1046534  }
  0x43   :  { %v97_v55 = vadd.f32 %v96_v46, %v95_v38  ;;  %v117_v56 = vrot.slane %v116_v47, 1  ;;  %v124_v57 = vrot.slane %v123_v48, 1  ;;  %v137_v58 = vadd.f32 %v136_v49, %v135_v41  ;;  %v180_v41 = vld [vmem:[%s1090_s1 + $0x38] sm:$0xff] }
  0x44   :  { %vm167_vm9 = vcmask 1047559   ;;  %v104_v59 = vadd.f32 %v103_v50, %v102_v42  ;;  %v111_v60 = vadd.f32 %v110_v51, %v109_v43  ;;  %v131_v61 = vrot.slane %v130_v52, 1 }
  0x45   :  { %v143_v62 = vrot.slane %v142_v53, 2  ;;  %v118_v3 = vadd.f32 %v117_v56, %v116_v47  ;;  %v125_v4 = vadd.f32 %v124_v57, %v123_v48  ;;  %v138_v5 = vrot.slane %v137_v58, 1 }
  0x46   :  { %v182_v6 = vsel %vm79_vm1, %v173_v54, 0.0  ;;  %v132_v7 = vadd.f32 %v131_v61, %v130_v52  ;;  %v156_v9 = vsel %vm155_vm3, %v104_v59, %v97_v55  ;;  %v189_v15 = vsel %vm79_vm1, %v174_v63, 0.0 }
  0x47   :  { %v144_v8 = vadd.f32 %v143_v62, %v142_v53  ;;  %v183_v12 = vrot.slane %v182_v6, 4  ;;  %v139_v13 = vadd.f32 %v138_v5, %v137_v58  ;;  %v158_v14 = vsel %vm157_vm4, %v111_v60, %v156_v9 }
  0x48   :  { %v196_v16 = vsel %vm79_vm1, %v175_v2, 0.0  ;;  %v160_v18 = vsel %vm159_vm5, %v118_v3, %v158_v14  ;;  %v190_v20 = vrot.slane %v189_v15, 4  ;;  %v203_v24 = vsel %vm79_vm1, %v176_v10, 0.0 }
  0x49   :  { %v145_v17 = vrot.slane %v144_v8, 1  ;;  %v184_v19 = vadd.f32 %v183_v12, %v182_v6  ;;  %v162_v21 = vsel %vm161_vm6, %v125_v4, %v160_v18  ;;  %v197_v23 = vrot.slane %v196_v16, 4  ;;  %v501_v6 = vld [vmem:[%s1096_s7] sm:$0xff] }
  0x4a   :  { %v210_v25 = vsel %vm79_vm1, %v177_v11, 0.0  ;;  %v164_v28 = vsel %vm163_vm7, %v132_v7, %v162_v21  ;;  %v191_v30 = vadd.f32 %v190_v20, %v189_v15  ;;  %v204_v34 = vrot.slane %v203_v24, 4  ;;  %v502_v7 = vld [vmem:[%s1096_s7 + $0x8] sm:$0xff]  ;;  %v503_v15 = vld [vmem:[%s1096_s7 + $0x10] sm:$0xff] }
  0x4b   :  { %v146_v27 = vadd.f32 %v145_v17, %v144_v8  ;;  %v185_v29 = vrot.slane %v184_v19, 2  ;;  %v166_v31 = vsel %vm165_vm8, %v139_v13, %v164_v28  ;;  %v198_v33 = vadd.f32 %v197_v23, %v196_v16  ;;  %v504_v16 = vld [vmem:[%s1096_s7 + $0x18] sm:$0xff]  ;;  %v506_v28 = vld [vmem:[%s1096_s7 + $0x28] sm:$0xff] }
  0x4c   :  { %v211_v35 = vrot.slane %v210_v25, 4  ;;  %v192_v38 = vrot.slane %v191_v30, 2  ;;  %v217_v39 = vsel %vm79_vm1, %v178_v22, 0.0  ;;  %v205_v43 = vadd.f32 %v204_v34, %v203_v24 }
  0x4d   :  { %v168_v36 = vsel %vm167_vm9, %v146_v27, %v166_v31  ;;  %v186_v37 = vadd.f32 %v185_v29, %v184_v19  ;;  %v199_v42 = vrot.slane %v198_v33, 2  ;;  %v218_v47 = vrot.slane %v217_v39, 4  ;;  %v505_v27 = vld [vmem:[%s1096_s7 + $0x20] sm:$0xff] }
  0x4e   :  { %v170_v40 = vadd.f32 %v168_v36, %v81_v26  ;;  %v212_v44 = vadd.f32 %v211_v35, %v210_v25  ;;  %v193_v46 = vadd.f32 %v192_v38, %v191_v30  ;;  %v224_v48 = vsel %vm79_vm1, %v179_v32, 0.0  ;;  %v172_v32 = vld [vmem:[#allocation3] sm:$0xff]  ;;  %v507_v35 = vld [vmem:[%s1096_s7 + $0x30] sm:$0xff]  ;;  %v508_v36 = vld [vmem:[%s1096_s7 + $0x38] sm:$0xff] }
  0x4f   :  { %v187_v45 = vrot.slane %v186_v37, 1  ;;  %v200_v49 = vadd.f32 %v199_v42, %v198_v33  ;;  %v206_v50 = vrot.slane %v205_v43, 2  ;;  %v225_v52 = vrot.slane %v224_v48, 4 }
  0x50   :  { %171 = vst.msk [vmem:[#allocation2] sm:$0xff] %vm77_vm0, %v170_v40  ;;  %v213_v51 = vrot.slane %v212_v44, 2  ;;  %v194_v54 = vrot.slane %v193_v46, 1  ;;  %v219_v55 = vadd.f32 %v218_v47, %v217_v39  ;;  %v231_v56 = vsel %vm79_vm1, %v180_v41, 0.0  ;;  %v262_v40 = vld [vmem:[#allocation4] sm:$0xff]  ;;  %v263_v41 = vld [vmem:[#allocation4 + $0x8] sm:$0xff] }
  0x51   :  { %v188_v53 = vadd.f32 %v187_v45, %v186_v37  ;;  %v201_v57 = vrot.slane %v200_v49, 1  ;;  %v207_v58 = vadd.f32 %v206_v50, %v205_v43  ;;  %v226_v60 = vadd.f32 %v225_v52, %v224_v48  ;;  %v413_v43 = vld [vmem:[#allocation8] sm:$0xff]  ;;  %v415_v48 = vld [vmem:[#allocation8 + $0x10] sm:$0xff]  ;;  %v509_v52 = vld [vmem:[%s1096_s7 + $0x40] sm:$0xff] }
  0x52   :  { %v214_v59 = vadd.f32 %v213_v51, %v212_v44  ;;  %v195_v61 = vadd.f32 %v194_v54, %v193_v46  ;;  %v220_v62 = vrot.slane %v219_v55, 2  ;;  %v232_v63 = vrot.slane %v231_v56, 4  ;;  %v414_v44 = vld [vmem:[#allocation8 + $0x8] sm:$0xff] }
  0x53   :  { %v202_v2 = vadd.f32 %v201_v57, %v200_v49  ;;  %v208_v3 = vrot.slane %v207_v58, 1  ;;  %v227_v5 = vrot.slane %v226_v60, 2  ;;  %v711_v19 = vpack.c.bf16 %v502_v7, %v501_v6  ;;  %v416_v49 = vld [vmem:[#allocation8 + $0x18] sm:$0xff]  ;;  %v261_v51 = vld [vmem:[%s1091_s2] sm:$0xff] }
  0x54   :  { %v215_v4 = vrot.slane %v214_v59, 1  ;;  %v221_v8 = vadd.f32 %v220_v62, %v219_v55  ;;  %v233_v9 = vadd.f32 %v232_v63, %v231_v56  ;;  %v246_v10 = vsel %vm155_vm3, %v195_v61, %v188_v53  ;;  %v510_v53 = vld [vmem:[%s1096_s7 + $0x48] sm:$0xff]  ;;  %v512_v55 = vld [vmem:[%s1096_s7 + $0x58] sm:$0xff]  ;;  %v513_v57 = vld [vmem:[%s1096_s7 + $0x60] sm:$0xff] }
  0x55   :  { %v209_v11 = vadd.f32 %v208_v3, %v207_v58  ;;  %v228_v13 = vadd.f32 %v227_v5, %v226_v60  ;;  %v247_v14 = vsel %vm157_vm4, %v202_v2, %v246_v10  ;;  %712 = vmatpush3.bf16.msra.mxu0 %v711_v19  ;;  %v714_v25 = vpack.c.bf16 %v504_v16, %v503_v15  ;;  %v514_v58 = vld [vmem:[%s1096_s7 + $0x68] sm:$0xff]  ;;  %v515_v60 = vld [vmem:[%s1096_s7 + $0x70] sm:$0xff]  ;;  %v516_v61 = vld [vmem:[%s1096_s7 + $0x78] sm:$0xff] }
  0x56   :  { %v216_v12 = vadd.f32 %v215_v4, %v214_v59  ;;  %v222_v17 = vrot.slane %v221_v8, 1  ;;  %v234_v18 = vrot.slane %v233_v9, 2  ;;  %713 = vmatprep.subr.bf16.mxu0 %v817_v0  ;;  %v717_v34 = vpack.c.bf16 %v506_v28, %v505_v27 }
  0x57   :  { %v229_v20 = vrot.slane %v228_v13, 1  ;;  %v248_v21 = vsel %vm159_vm5, %v209_v11, %v247_v14  ;;  %v720_v39 = vpack.c.bf16 %v508_v36, %v507_v35  ;;  %v702_v42 = vpack.c.bf16 %v263_v41, %v262_v40  ;;  %v259_v46 = vld [vmem:[#allocation2] sm:$0xff] }
  0x58   :  { %v223_v22 = vadd.f32 %v222_v17, %v221_v8  ;;  %v235_v23 = vadd.f32 %v234_v18, %v233_v9  ;;  %v249_v24 = vsel %vm161_vm6, %v216_v12, %v248_v21  ;;  %v705_v47 = vpack.c.bf16 %v414_v44, %v413_v43  ;;  %v606_v11 = vld [vmem:[%s1097_s8] ss:$0 sm:$0xff] }
  0x59   :  { %v230_v26 = vadd.f32 %v229_v20, %v228_v13  ;;  %715 = vmatpush3.bf16.msra.mxu0 %v714_v25  ;;  %v708_v50 = vpack.c.bf16 %v416_v49, %v415_v48  ;;  %vm417_vm10 = vcmask 261120   ;;  %v723_v54 = vpack.c.bf16 %v510_v53, %v509_v52 }
  0x5a   :  { %v236_v29 = vrot.slane %v235_v23, 1  ;;  %v250_v30 = vsel %vm163_vm7, %v223_v22, %v249_v24  ;;  %716 = vmatprep.subr.bf16.mxu0 %v817_v0  ;;  %v729_v59 = vpack.c.bf16 %v514_v58, %v513_v57  ;;  %v732_v62 = vpack.c.bf16 %v516_v61, %v515_v60 }
  0x5b   :  { %v251_v31 = vsel %vm165_vm8, %v230_v26, %v250_v30  ;;  %vm594_vm11 = vcmask 23552  }
  0x5c   :  { %v237_v33 = vadd.f32 %v236_v29, %v235_v23 }
  0x5d   :  { %718 = vmatpush3.bf16.msra.mxu0 %v717_v34 }
  0x5e   :  { %v252_v37 = vsel %vm167_vm9, %v237_v33, %v251_v31  ;;  %719 = vmatprep.subr.bf16.mxu0 %v817_v0 }
  0x5f   :  { %v254_v38 = vadd.f32 %v252_v37, %v172_v32 }
  0x61   :  { %255 = vst.msk [vmem:[#allocation3] sm:$0xff] %vm79_vm1, %v254_v38  ;;  %721 = vmatpush3.bf16.msra.mxu0 %v720_v39 }
  0x62   :  { %722 = vmatprep.subr.bf16.mxu0 %v817_v0 }
  0x65   :  { %724 = vmatpush3.bf16.msra.mxu0 %v723_v54 }
  0x66   :  { %725 = vmatprep.subr.bf16.mxu0 %v817_v0 }
  0x68   :  { %v260_v45 = vld [vmem:[#allocation3] sm:$0xff] }
  0x69   :  { %643 = vmatmul.mubr.msk.f32.vlgmr.msra.gmra.mrb[0].mxu1 %vm79_vm1, %v260_v45 }
  0x6a   :  { %703 = vmatpush3.bf16.msra.mxu1 %v702_v42  ;;  %649 = vmatprep.mubr.msk.f32.mxu1 %vm819_vm2, %v818_v1 }
  0x6b   :  { %704 = vmatprep.subr.bf16.mxu1 %v817_v0 }
  0x6d   :  { %650 = vmatmul.mubr.msk.f32.vlgmr.msra.gmra.mrb[2].mxu1 %vm77_vm0, %v259_v46 }
  0x6e   :  { %706 = vmatpush3.bf16.msra.mxu1 %v705_v47  ;;  %660 = vmatprep.mubr.msk.f32.mxu1 %vm819_vm2, %v818_v1  ;;  %v511_v1 = vld [vmem:[%s1096_s7 + $0x50] sm:$0xff] }
  0x6f   :  { %707 = vmatprep.subr.bf16.mxu1 %v817_v0  ;;  %v726_v56 = vpack.c.bf16 %v512_v55, %v511_v1 }
  0x71   :  { %727 = vmatpush3.bf16.msra.mxu0 %v726_v56 }
  0x72   :  { %709 = vmatpush3.bf16.msra.mxu1 %v708_v50  ;;  %728 = vmatprep.subr.bf16.mxu0 %v817_v0 }
  0x75   :  { %661 = vmatmul.mubr.msk.f32.vlgmr.msra.gmra.mrb[4].mxu1 %vm417_vm10, %v261_v51  ;;  %730 = vmatpush3.bf16.msra.mxu0 %v729_v59 }
  0x76   :  { %731 = vmatprep.subr.bf16.mxu0 %v817_v0  ;;  %v605_v0 = vld [vmem:[%s1095_s6] ss:$0 sm:$0xff] }
  0x79   :  { %733 = vmatpush3.bf16.msra.mxu0 %v732_v62 }
 0x13c   :  { %v336_v63 = vpop.f32.mrb[0].mxu1 }
 0x13d   :  { %v644_v2 = vpop.f32.mrb[1].mxu1 }
 0x140   :  { %v409_v3 = vpop.f32.mrb[2].mxu1 }
 0x141   :  { %v410_v4 = vadd.f32 %v409_v3, %v336_v63  ;;  %v651_v5 = vpop.f32.mrb[3].mxu1 }
 0x148   :  { %v487_v6 = vpop.f32.mrb[4].mxu1 }
 0x149   :  { %v491_v7 = vadd.f32 %v487_v6, %v410_v4  ;;  %v662_v8 = vpop.f32.mrb[5].mxu1 }
 0x14b   :  { %v499_v9 = vadd.f32 %v605_v0, %v491_v7 }
 0x14d   :  { %v500_v10 = vmax.f32 %v499_v9, 0.0 }
 0x14f   :  { %696 = vmatmul.mubr.f32.vlgmr.msra.gmra.mrb[0].mxu0 %v500_v10 }
 0x222   :  { %v590_v12 = vpop.f32.mrb[0].mxu0 }
 0x223   :  { %v591_v13 = vadd.f32 %v606_v11, %v590_v12  ;;  %v697_v14 = vpop.f32.mrb[1].mxu0 }
 0x225   :  { %595 = vst.msk [vmem:[%s1098_s9] sm:$0xff] %vm594_vm11, %v591_v13 }
 0x226   :  { %600 = vsyncpa [#allocation5], 1 }
 0x227   :  { %601 = vsyncpa [#allocation7], 1 }

</bundles_post_ra>
